<compile_context>
chip_gen: v7x
topology: tpu7x:2x2x1
jax: 0.10.0
libtpu: 0.0.40
codegen_flags: <defaults>
</compile_context>

<pallas_src>
import functools

import jax
import jax.numpy as jnp
import numpy as np
from jax.experimental import pallas as pl
from jax.experimental.pallas import tpu as pltpu


# From this vocab / dim on, the embedding lookup uses one-hot @ MXU
# (channels_last only) instead of an unrolled VPU select chain.
_MXU_MIN_VOCAB = 16
_MXU_MIN_DIM = 32


# ------------------------------ tiling helper ------------------------------ #

def _choose_l_tile(l_pad, per_lane_bytes, *, budget_bytes=12 << 20, min_steps=4):
    """Pick the sequence-dim tile (always a multiple of 128 lanes).

    Largest candidate that (a) divides the padded length, (b) keeps the
    per-step VMEM footprint (double-buffered blocks + in-kernel scratch,
    `per_lane_bytes` per lane) under `budget_bytes` — safe on v7x (64 MiB
    physical / 32 MiB scoped per TC) and v5e (16 MiB scoped default) — and
    (c) leaves at least `min_steps` grid steps when the sequence is long
    enough (v7x: 2 TensorCores x >= 2-deep double-buffered pipeline).
    Short sequences just take the largest tile that fits.
    """
    per_lane_bytes = max(int(per_lane_bytes), 1)
    max_steps_possible = max(l_pad // 128, 1)
    lt = 128
    for cand in (128, 256, 512, 1024, 2048, 4096):
        if cand > l_pad or l_pad % cand != 0:
            continue
        if cand * per_lane_bytes > budget_bytes:
            continue
        if (l_pad // cand) >= min_steps or max_steps_possible < min_steps:
            lt = cand
    return lt


# ------------------------------ fused kernel ------------------------------- #

def _build_fused_kernel(entries, n_groups, channels_last):
    """Build the fused multi-group, multi-key embedding kernel.

    entries: static list of dicts
        {'kind': 'emb'|'onehot', 'dim': int, 'vocab': int,
         'w_slot': int|None, 'use_mxu': bool}
    Kernel ref layout (positional):
        [idx,                      # (G, K, B, Lt) int32, all (group,key) stacked
         w_0, ..., w_{E-1},        # embedding tables ((D,V) if channels_last else (V,D))
         out_0, ..., out_{G-1}]    # (B, D_total, Lt) or (B, Lt, D_total)
    """
    n_w = sum(1 for e in entries if e['kind'] == 'emb')

    def kernel(*refs):
        idx_ref = refs[0]
        w_refs = refs[1:1 + n_w]
        out_refs = refs[1 + n_w:]
        _, _, B, Lt = idx_ref.shape

        # ---- per-key constants, hoisted OUT of the group loop (once / step) ----
        # (JAX does not CSE broadcast_in_dim, so the expensive lane-broadcasts of
        #  weight columns and the iotas are emitted exactly once per key here.)
        key_consts = []
        for ent in entries:
            if ent['kind'] == 'emb':
                wt = w_refs[ent['w_slot']][...]          # (D,V) cl / (V,D) cf
                if ent['use_mxu']:
                    # channels_last only: bf16 weights + (V, Lt) class iota.
                    D, V = wt.shape
                    iota = jax.lax.broadcasted_iota(jnp.int32, (V, Lt), 0)
                    key_consts.append((wt.astype(jnp.bfloat16), iota))
                else:
                    if channels_last:
                        D, V = wt.shape
                        cols = [jnp.broadcast_to(wt[:, v:v + 1], (D, Lt))
                                for v in range(V)]
                    else:
                        V, D = wt.shape
                        cols = [jnp.broadcast_to(wt[v:v + 1, :], (Lt, D))
                                for v in range(V)]
                    key_consts.append(cols)
            else:
                C = ent['dim']
                if channels_last:
                    key_consts.append(
                        jax.lax.broadcasted_iota(jnp.int32, (C, Lt), 0))
                else:
                    key_consts.append(
                        jax.lax.broadcasted_iota(jnp.int32, (Lt, C), 1))

        for g in range(n_groups):
            out_ref = out_refs[g]
            off = 0
            for ki, ent in enumerate(entries):
                x = idx_ref[g, ki]                        # (B, Lt) int32
                dim = ent['dim']

                if ent['kind'] == 'emb':
                    if ent['use_mxu']:
                        # one-hot @ MXU (channels_last): out[b] = W^T(D,V) @ oh(V,Lt)
                        wt_b, iota = key_consts[ki]
                        D, V = wt_b.shape
                        for b in range(B):
                            oh = (x[b:b + 1, :] == iota).astype(jnp.bfloat16)
                            res = jnp.dot(wt_b, oh,
                                          preferred_element_type=jnp.float32)
                            out_ref[b, off:off + D, :] = res.astype(out_ref.dtype)
                    else:
                        # small vocab: pure VPU select chain (V selects, no adds)
                        cols = key_consts[ki]
                        V = len(cols)
                        if channels_last:
                            D = cols[0].shape[0]
                            xm = jnp.broadcast_to(x[:, None, :], (B, D, Lt))
                            acc = jnp.zeros((B, D, Lt), jnp.float32)
                            for v in range(V):
                                acc = jnp.where(xm == v, cols[v], acc)
                            out_ref[:, off:off + D, :] = acc.astype(out_ref.dtype)
                        else:
                            D = cols[0].shape[1]
                            xm = jnp.broadcast_to(x[:, :, None], (B, Lt, D))
                            acc = jnp.zeros((B, Lt, D), jnp.float32)
                            for v in range(V):
                                acc = jnp.where(xm == v, cols[v], acc)
                            out_ref[:, :, off:off + D] = acc.astype(out_ref.dtype)
                else:
                    # one-hot encoding piece
                    C = dim
                    iota = key_consts[ki]
                    if channels_last:
                        oh = (x[:, None, :] == iota[None, :, :])   # (B, C, Lt)
                        out_ref[:, off:off + C, :] = oh.astype(out_ref.dtype)
                    else:
                        oh = (x[:, :, None] == iota[None, :, :])   # (B, Lt, C)
                        out_ref[:, :, off:off + C] = oh.astype(out_ref.dtype)
                off += dim

    return kernel


def fused_seq_embed(entries, weights, groups, channels_last, out_dtype):
    """Run the fused embedding kernel.

    entries:  static scheme description ({'kind','dim','w_slot'} per key).
    weights:  list of (V, D) float32 tables, indexed by entry['w_slot'].
    groups:   list (one per output group) of lists of (B, L) int index arrays,
              in `entries` order.
    Returns:  list of per-group outputs, (B, D_total, L) if channels_last else
              (B, L, D_total).
    """
    n_groups = len(groups)
    n_keys = len(entries)
    d_total = sum(e['dim'] for e in entries)

    # Static per-key description: vocab size + VPU-select vs MXU-one-hot choice.
    norm_entries = []
    for e in entries:
        ne = dict(e)
        if e['kind'] == 'emb':
            V, D = weights[e['w_slot']].shape
            ne['vocab'] = int(V)
            ne['use_mxu'] = bool(channels_last and
                                 (V >= _MXU_MIN_VOCAB or D >= _MXU_MIN_DIM))
        else:
            ne['vocab'] = int(e['dim'])
            ne['use_mxu'] = False
        norm_entries.append(ne)

    # Stack every (group, key) index sequence into one (G, K, B, L) int32 input.
    for grp in groups:
        assert len(grp) == n_keys
    idx = jnp.stack([jnp.stack([jnp.asarray(a).astype(jnp.int32) for a in grp])
                     for grp in groups])
    G, K, B, L = idx.shape

    # Pad the sequence dim to a lane multiple: lane-dense (unmasked) output
    # stores and a pipelined grid even when L % 128 != 0.  Sliced back below.
    L_pad = max(128, ((L + 127) // 128) * 128)
    if L_pad != L:
        idx = jnp.pad(idx, ((0, 0), (0, 0), (0, 0), (0, L_pad - L)))

    # Kernel-orientation weight tables (transposed -> lane-dense channels_last).
    w_arrays = []
    for e in norm_entries:
        if e['kind'] == 'emb':
            w = weights[e['w_slot']].astype(jnp.float32)
            w_arrays.append(w.T if channels_last else w)

    # VMEM footprint per lane of L per grid step (double-buffered blocks +
    # hoisted weight columns + f32 temporaries) -> VMEM-aware tile choice.
    out_itemsize = jnp.dtype(out_dtype).itemsize
    vpu_cols = sum(4 * e['dim'] * e['vocab'] for e in norm_entries
                   if e['kind'] == 'emb' and not e['use_mxu'])
    mxu_tmp = sum(B * (2 * e['vocab'] + 6 * e['dim']) for e in norm_entries
                  if e['kind'] == 'emb' and e['use_mxu'])
    per_lane = (2 * (G * K * B * 4 + G * B * d_total * out_itemsize)
                + G * B * d_total * 4 + vpu_cols + mxu_tmp)
    Lt = _choose_l_tile(L_pad, per_lane)
    grid = (L_pad // Lt,)

    idx_spec = pl.BlockSpec((G, K, B, Lt), lambda l: (0, 0, 0, l))
    w_specs = [pl.BlockSpec(tuple(w.shape), lambda l: (0, 0)) for w in w_arrays]
    if channels_last:
        out_shape_one = (B, d_total, L_pad)
        out_spec = pl.BlockSpec((B, d_total, Lt), lambda l: (0, 0, l))
    else:
        out_shape_one = (B, L_pad, d_total)
        out_spec = pl.BlockSpec((B, Lt, d_total), lambda l: (0, l, 0))

    kernel = _build_fused_kernel(norm_entries, n_groups, channels_last)

    outs = pl.pallas_call(
        kernel,
        grid=grid,
        out_shape=[jax.ShapeDtypeStruct(out_shape_one, out_dtype)] * n_groups,
        in_specs=[idx_spec] + w_specs,
        out_specs=[out_spec] * n_groups,
        compiler_params=pltpu.CompilerParams(
            dimension_semantics=("parallel",)),
    )(idx, *w_arrays)

    if not isinstance(outs, (list, tuple)):
        outs = [outs]
    outs = list(outs)
    if L_pad != L:
        outs = [(o[:, :, :L] if channels_last else o[:, :L, :]) for o in outs]
    return outs


# ------------------------- module re-implementations ----------------------- #

class OneHotEncoding:
    def __init__(self, num_classes, output_fmt=None):
        self.num_classes = num_classes
        self.output_fmt = output_fmt

    def __call__(self, x):
        channels_last = (self.output_fmt == 'channels_last')
        entries = [dict(kind='onehot', dim=self.num_classes, w_slot=None)]
        return fused_seq_embed(entries, [], [[x]], channels_last, jnp.int32)[0]

    def get_output_dim(self):
        return self.num_classes


class Embedding:
    """nn.Embedding equivalent; weight initialized N(0, 1) deterministically."""

    def __init__(self, num_embeddings, embedding_dim, key):
        self.num_embeddings = num_embeddings
        self.embedding_dim = embedding_dim
        self.weight = jax.random.normal(
            key, (num_embeddings, embedding_dim), dtype=jnp.float32)

    def __call__(self, x):
        entries = [dict(kind='emb', dim=self.embedding_dim, w_slot=0)]
        # nn.Embedding returns (B, L, D) -> channels_first layout of the kernel.
        return fused_seq_embed(entries, [self.weight], [[x]],
                               channels_last=False, out_dtype=jnp.float32)[0]


class SeqEmbedding:
    def __init__(self, emb_scheme, output_fmt='channels_last', key=None):
        assert output_fmt in ['channels_last', 'channels_first']
        self.emb_scheme = emb_scheme
        self.output_fmt = output_fmt
        self.embeddings = {}
        self._entries = []     # static kernel description, scheme order
        self._weights = []     # (V, D) tables, w_slot order
        key = jax.random.PRNGKey(0) if key is None else key
        for emb_key, emb_kwargs in emb_scheme.items():
            if 'num_classes' in emb_kwargs:
                if 'output_fmt' in emb_kwargs:
                    raise ValueError(
                        'output_fmt should not be specified for OneHotEncoding '
                        'kwargs when using MultiSeqEmbedding.')
                self.embeddings[emb_key] = OneHotEncoding(**emb_kwargs)
                self._entries.append(
                    dict(key=emb_key, kind='onehot',
                         dim=emb_kwargs['num_classes'], w_slot=None))
            else:
                key, sub = jax.random.split(key)
                mod = Embedding(key=sub, **emb_kwargs)
                self.embeddings[emb_key] = mod
                self._entries.append(
                    dict(key=emb_key, kind='emb', dim=mod.embedding_dim,
                         w_slot=len(self._weights)))
                self._weights.append(mod.weight)
        piece_dtypes = [jnp.float32 if e['kind'] == 'emb' else jnp.int32
                        for e in self._entries]
        self._out_dtype = functools.reduce(jnp.promote_types, piece_dtypes)

    def embed_groups(self, group_inputs):
        """group_inputs: dict group_name -> {scheme_key: (B, L) int32}.
        One fused pallas_call for all groups and keys."""
        group_names = list(group_inputs.keys())
        groups = [[group_inputs[g][e['key']] for e in self._entries]
                  for g in group_names]
        outs = fused_seq_embed(
            self._entries, self._weights, groups,
            channels_last=(self.output_fmt == 'channels_last'),
            out_dtype=self._out_dtype)
        return dict(zip(group_names, outs))

    def __call__(self, x):
        return self.embed_groups({'_': x})['_']

    def get_output_dim(self):
        out = 0
        for emb_kwargs in self.emb_scheme.values():
            out += emb_kwargs.get('num_classes', emb_kwargs.get('embedding_dim'))
        return out


class MultiSeqEmbedding:
    def __init__(self, input_map, emb_scheme, output_fmt='channels_last',
                 key=None):
        self.input_map = input_map
        self.output_fmt = output_fmt
        self.embedding = SeqEmbedding(emb_scheme, output_fmt=output_fmt, key=key)

    def __call__(self, x):
        # All (group, key) lookups + concat + permute fused into ONE pallas_call.
        group_inputs = {
            group: {type_name: x[in_key] for in_key, type_name in emb_map.items()}
            for group, emb_map in self.input_map.items()
        }
        return self.embedding.embed_groups(group_inputs)

    def get_output_dim(self):
        return self.embedding.get_output_dim()


# ----------------------------------- main ----------------------------------- #

if __name__ == "__main__":
    B, L = 2, 8
    root = jax.random.PRNGKey(0)
    (k_params, k_fw_nt, k_fw_st, k_rv_nt, k_rv_st, k_oh,
     k_b1, k_b2, k_b3, k_b4, k_p4, k_x4, k_pcf, k_xcf) = jax.random.split(root, 14)

    # --- instance 1: two nn.Embedding types, shared across two input groups ---
    emb_scheme = {
        "nt":     {"num_embeddings": 8, "embedding_dim": 16},
        "struct": {"num_embeddings": 6, "embedding_dim": 16},
    }
    input_map = {
        "fw": {"fw_nt": "nt", "fw_struct": "struct"},
        "rv": {"rv_nt": "nt", "rv_struct": "struct"},
    }
    model = MultiSeqEmbedding(input_map, emb_scheme, output_fmt='channels_last',
                              key=k_params)

    x = {
        "fw_nt":     jax.random.randint(k_fw_nt, (B, L), 0, 8, dtype=jnp.int32),
        "fw_struct": jax.random.randint(k_fw_st, (B, L), 0, 6, dtype=jnp.int32),
        "rv_nt":     jax.random.randint(k_rv_nt, (B, L), 0, 8, dtype=jnp.int32),
        "rv_struct": jax.random.randint(k_rv_st, (B, L), 0, 6, dtype=jnp.int32),
    }
    out = jax.block_until_ready(model(x))

    D_total = model.get_output_dim()
    assert out["fw"].shape == (B, D_total, L)
    assert out["rv"].shape == (B, D_total, L)

    # cross-check the fused kernel against a plain-JAX gather + concat + permute
    w_nt = model.embedding.embeddings["nt"].weight
    w_st = model.embedding.embeddings["struct"].weight
    for grp, nt_key, st_key in [("fw", "fw_nt", "fw_struct"),
                                ("rv", "rv_nt", "rv_struct")]:
        ref = jnp.concatenate(
            [jnp.take(w_nt, x[nt_key], axis=0),
             jnp.take(w_st, x[st_key], axis=0)], axis=-1).transpose(0, 2, 1)
        np.testing.assert_allclose(np.asarray(out[grp]), np.asarray(ref),
                                   rtol=0, atol=0)

    # --- instance 2: pure OneHotEncoding scheme ---
    oh_model = MultiSeqEmbedding(
        input_map={"x": {"seq": "base"}},
        emb_scheme={"base": {"num_classes": 4}},
        output_fmt='channels_last',
    )
    x_oh = {"seq": jax.random.randint(k_oh, (B, L), 0, 4, dtype=jnp.int32)}
    out_oh = jax.block_until_ready(oh_model(x_oh))
    assert out_oh["x"].shape == (B, 4, L)
    ref_oh = jax.nn.one_hot(x_oh["seq"], 4, dtype=jnp.int32).transpose(0, 2, 1)
    np.testing.assert_array_equal(np.asarray(out_oh["x"]), np.asarray(ref_oh))

    # --- instance 3: larger sequence exercising the tiled (multi-step) grid ---
    Lb = 1024   # -> Lt = 256, grid = (4,): lane-dense stores + pipelined steps
    xb = {
        "fw_nt":     jax.random.randint(k_b1, (B, Lb), 0, 8, dtype=jnp.int32),
        "fw_struct": jax.random.randint(k_b2, (B, Lb), 0, 6, dtype=jnp.int32),
        "rv_nt":     jax.random.randint(k_b3, (B, Lb), 0, 8, dtype=jnp.int32),
        "rv_struct": jax.random.randint(k_b4, (B, Lb), 0, 6, dtype=jnp.int32),
    }
    out_b = jax.block_until_ready(model(xb))
    assert out_b["fw"].shape == (B, D_total, Lb)
    ref_fw_b = jnp.concatenate(
        [jnp.take(w_nt, xb["fw_nt"], axis=0),
         jnp.take(w_st, xb["fw_struct"], axis=0)], axis=-1).transpose(0, 2, 1)
    np.testing.assert_allclose(np.asarray(out_b["fw"]), np.asarray(ref_fw_b),
                               rtol=0, atol=0)

    # --- instance 4: larger vocabulary -> one-hot @ MXU path (channels_last) ---
    # Weights go through bf16 MXU passes, so compare with a tolerance.
    big_model = MultiSeqEmbedding(
        input_map={"x": {"seq": "tok"}},
        emb_scheme={"tok": {"num_embeddings": 32, "embedding_dim": 32}},
        output_fmt='channels_last', key=k_p4,
    )
    L4 = 256
    x4 = {"seq": jax.random.randint(k_x4, (B, L4), 0, 32, dtype=jnp.int32)}
    out4 = jax.block_until_ready(big_model(x4))
    assert out4["x"].shape == (B, 32, L4)
    w_tok = big_model.embedding.embeddings["tok"].weight
    ref4 = jnp.take(w_tok, x4["seq"], axis=0).transpose(0, 2, 1)
    np.testing.assert_allclose(np.asarray(out4["x"]), np.asarray(ref4),
                               rtol=2e-2, atol=2e-2)

    # --- instance 5: channels_first layout (SeqEmbedding, exact VPU path) ---
    cf_model = SeqEmbedding({"aa": {"num_embeddings": 5, "embedding_dim": 16}},
                            output_fmt='channels_first', key=k_pcf)
    x_cf = jax.random.randint(k_xcf, (B, L), 0, 5, dtype=jnp.int32)
    out_cf = jax.block_until_ready(cf_model({"aa": x_cf}))
    assert out_cf.shape == (B, L, 16)
    ref_cf = jnp.take(cf_model.embeddings["aa"].weight, x_cf, axis=0)
    np.testing.assert_allclose(np.asarray(out_cf), np.asarray(ref_cf),
                               rtol=0, atol=0)

    print("KERNEL_OK")
</pallas_src>

<mosaic_0001>
module attributes {stable_mosaic.version = 11 : i64} {
  func.func @kernel(%arg0: i32, %arg1: memref<2x2x2x128xi32, #tpu.memory_space<vmem>>, %arg2: memref<16x8xf32, #tpu.memory_space<vmem>>, %arg3: memref<16x6xf32, #tpu.memory_space<vmem>>, %arg4: memref<2x32x128xf32, #tpu.memory_space<vmem>>, %arg5: memref<2x32x128xf32, #tpu.memory_space<vmem>>) attributes {dimension_semantics = [#tpu.dimension_semantics<parallel>], iteration_bounds = array<i64: 1>, scalar_prefetch = 0 : i64, scratch_operands = 0 : i64, tpu.core_type = #tpu.core_type<tc>, window_params = [{transform_indices = @transform_0, window_bounds = array<i64: 2, 2, 2, 128>}, {pipeline_mode = #tpu.pipeline_mode<synchronous>, transform_indices = @transform_1, window_bounds = array<i64: 16, 8>}, {pipeline_mode = #tpu.pipeline_mode<synchronous>, transform_indices = @transform_2, window_bounds = array<i64: 16, 6>}, {transform_indices = @transform_3, window_bounds = array<i64: 2, 32, 128>}, {transform_indices = @transform_4, window_bounds = array<i64: 2, 32, 128>}]} {
    %c0 = arith.constant 0 : index
    %c0_0 = arith.constant 0 : index
    %0 = vector.load %arg2[%c0, %c0_0] : memref<16x8xf32, #tpu.memory_space<vmem>>, vector<16x8xf32>
    %1 = vector.extract_strided_slice %0 {offsets = [0, 0], sizes = [16, 1], strides = [1, 1]} : vector<16x8xf32> to vector<16x1xf32>
    %2 = vector.shape_cast %1 : vector<16x1xf32> to vector<16x1xf32>
    %3 = vector.broadcast %2 : vector<16x1xf32> to vector<16x128xf32>
    %4 = vector.extract_strided_slice %0 {offsets = [0, 1], sizes = [16, 1], strides = [1, 1]} : vector<16x8xf32> to vector<16x1xf32>
    %5 = vector.shape_cast %4 : vector<16x1xf32> to vector<16x1xf32>
    %6 = vector.broadcast %5 : vector<16x1xf32> to vector<16x128xf32>
    %7 = vector.extract_strided_slice %0 {offsets = [0, 2], sizes = [16, 1], strides = [1, 1]} : vector<16x8xf32> to vector<16x1xf32>
    %8 = vector.shape_cast %7 : vector<16x1xf32> to vector<16x1xf32>
    %9 = vector.broadcast %8 : vector<16x1xf32> to vector<16x128xf32>
    %10 = vector.extract_strided_slice %0 {offsets = [0, 3], sizes = [16, 1], strides = [1, 1]} : vector<16x8xf32> to vector<16x1xf32>
    %11 = vector.shape_cast %10 : vector<16x1xf32> to vector<16x1xf32>
    %12 = vector.broadcast %11 : vector<16x1xf32> to vector<16x128xf32>
    %13 = vector.extract_strided_slice %0 {offsets = [0, 4], sizes = [16, 1], strides = [1, 1]} : vector<16x8xf32> to vector<16x1xf32>
    %14 = vector.shape_cast %13 : vector<16x1xf32> to vector<16x1xf32>
    %15 = vector.broadcast %14 : vector<16x1xf32> to vector<16x128xf32>
    %16 = vector.extract_strided_slice %0 {offsets = [0, 5], sizes = [16, 1], strides = [1, 1]} : vector<16x8xf32> to vector<16x1xf32>
    %17 = vector.shape_cast %16 : vector<16x1xf32> to vector<16x1xf32>
    %18 = vector.broadcast %17 : vector<16x1xf32> to vector<16x128xf32>
    %19 = vector.extract_strided_slice %0 {offsets = [0, 6], sizes = [16, 1], strides = [1, 1]} : vector<16x8xf32> to vector<16x1xf32>
    %20 = vector.shape_cast %19 : vector<16x1xf32> to vector<16x1xf32>
    %21 = vector.broadcast %20 : vector<16x1xf32> to vector<16x128xf32>
    %22 = vector.extract_strided_slice %0 {offsets = [0, 7], sizes = [16, 1], strides = [1, 1]} : vector<16x8xf32> to vector<16x1xf32>
    %23 = vector.shape_cast %22 : vector<16x1xf32> to vector<16x1xf32>
    %24 = vector.broadcast %23 : vector<16x1xf32> to vector<16x128xf32>
    %c0_1 = arith.constant 0 : index
    %c0_2 = arith.constant 0 : index
    %25 = vector.load %arg3[%c0_1, %c0_2] : memref<16x6xf32, #tpu.memory_space<vmem>>, vector<16x6xf32>
    %26 = vector.extract_strided_slice %25 {offsets = [0, 0], sizes = [16, 1], strides = [1, 1]} : vector<16x6xf32> to vector<16x1xf32>
    %27 = vector.shape_cast %26 : vector<16x1xf32> to vector<16x1xf32>
    %28 = vector.broadcast %27 : vector<16x1xf32> to vector<16x128xf32>
    %29 = vector.extract_strided_slice %25 {offsets = [0, 1], sizes = [16, 1], strides = [1, 1]} : vector<16x6xf32> to vector<16x1xf32>
    %30 = vector.shape_cast %29 : vector<16x1xf32> to vector<16x1xf32>
    %31 = vector.broadcast %30 : vector<16x1xf32> to vector<16x128xf32>
    %32 = vector.extract_strided_slice %25 {offsets = [0, 2], sizes = [16, 1], strides = [1, 1]} : vector<16x6xf32> to vector<16x1xf32>
    %33 = vector.shape_cast %32 : vector<16x1xf32> to vector<16x1xf32>
    %34 = vector.broadcast %33 : vector<16x1xf32> to vector<16x128xf32>
    %35 = vector.extract_strided_slice %25 {offsets = [0, 3], sizes = [16, 1], strides = [1, 1]} : vector<16x6xf32> to vector<16x1xf32>
    %36 = vector.shape_cast %35 : vector<16x1xf32> to vector<16x1xf32>
    %37 = vector.broadcast %36 : vector<16x1xf32> to vector<16x128xf32>
    %38 = vector.extract_strided_slice %25 {offsets = [0, 4], sizes = [16, 1], strides = [1, 1]} : vector<16x6xf32> to vector<16x1xf32>
    %39 = vector.shape_cast %38 : vector<16x1xf32> to vector<16x1xf32>
    %40 = vector.broadcast %39 : vector<16x1xf32> to vector<16x128xf32>
    %41 = vector.extract_strided_slice %25 {offsets = [0, 5], sizes = [16, 1], strides = [1, 1]} : vector<16x6xf32> to vector<16x1xf32>
    %42 = vector.shape_cast %41 : vector<16x1xf32> to vector<16x1xf32>
    %43 = vector.broadcast %42 : vector<16x1xf32> to vector<16x128xf32>
    %c0_3 = arith.constant 0 : index
    %c0_4 = arith.constant 0 : index
    %c0_5 = arith.constant 0 : index
    %c0_6 = arith.constant 0 : index
    %44 = vector.load %arg1[%c0_3, %c0_4, %c0_5, %c0_6] : memref<2x2x2x128xi32, #tpu.memory_space<vmem>>, vector<1x1x2x128xi32>
    %45 = vector.shape_cast %44 : vector<1x1x2x128xi32> to vector<2x128xi32>
    %46 = vector.shape_cast %45 : vector<2x128xi32> to vector<2x1x128xi32>
    %47 = vector.shape_cast %46 : vector<2x1x128xi32> to vector<2x1x128xi32>
    %48 = vector.broadcast %47 : vector<2x1x128xi32> to vector<2x16x128xi32>
    %cst = arith.constant 0.000000e+00 : f32
    %49 = vector.broadcast %cst : f32 to vector<2x16x128xf32>
    %c0_i32 = arith.constant 0 : i32
    %50 = vector.broadcast %c0_i32 : i32 to vector<2x16x128xi32>
    %51 = arith.cmpi eq, %48, %50 : vector<2x16x128xi32>
    %52 = vector.shape_cast %3 : vector<16x128xf32> to vector<1x16x128xf32>
    %53 = vector.broadcast %52 : vector<1x16x128xf32> to vector<2x16x128xf32>
    %54 = arith.select %51, %53, %49 : vector<2x16x128xi1>, vector<2x16x128xf32>
    %c1_i32 = arith.constant 1 : i32
    %55 = vector.broadcast %c1_i32 : i32 to vector<2x16x128xi32>
    %56 = arith.cmpi eq, %48, %55 : vector<2x16x128xi32>
    %57 = vector.shape_cast %6 : vector<16x128xf32> to vector<1x16x128xf32>
    %58 = vector.broadcast %57 : vector<1x16x128xf32> to vector<2x16x128xf32>
    %59 = arith.select %56, %58, %54 : vector<2x16x128xi1>, vector<2x16x128xf32>
    %c2_i32 = arith.constant 2 : i32
    %60 = vector.broadcast %c2_i32 : i32 to vector<2x16x128xi32>
    %61 = arith.cmpi eq, %48, %60 : vector<2x16x128xi32>
    %62 = vector.shape_cast %9 : vector<16x128xf32> to vector<1x16x128xf32>
    %63 = vector.broadcast %62 : vector<1x16x128xf32> to vector<2x16x128xf32>
    %64 = arith.select %61, %63, %59 : vector<2x16x128xi1>, vector<2x16x128xf32>
    %c3_i32 = arith.constant 3 : i32
    %65 = vector.broadcast %c3_i32 : i32 to vector<2x16x128xi32>
    %66 = arith.cmpi eq, %48, %65 : vector<2x16x128xi32>
    %67 = vector.shape_cast %12 : vector<16x128xf32> to vector<1x16x128xf32>
    %68 = vector.broadcast %67 : vector<1x16x128xf32> to vector<2x16x128xf32>
    %69 = arith.select %66, %68, %64 : vector<2x16x128xi1>, vector<2x16x128xf32>
    %c4_i32 = arith.constant 4 : i32
    %70 = vector.broadcast %c4_i32 : i32 to vector<2x16x128xi32>
    %71 = arith.cmpi eq, %48, %70 : vector<2x16x128xi32>
    %72 = vector.shape_cast %15 : vector<16x128xf32> to vector<1x16x128xf32>
    %73 = vector.broadcast %72 : vector<1x16x128xf32> to vector<2x16x128xf32>
    %74 = arith.select %71, %73, %69 : vector<2x16x128xi1>, vector<2x16x128xf32>
    %c5_i32 = arith.constant 5 : i32
    %75 = vector.broadcast %c5_i32 : i32 to vector<2x16x128xi32>
    %76 = arith.cmpi eq, %48, %75 : vector<2x16x128xi32>
    %77 = vector.shape_cast %18 : vector<16x128xf32> to vector<1x16x128xf32>
    %78 = vector.broadcast %77 : vector<1x16x128xf32> to vector<2x16x128xf32>
    %79 = arith.select %76, %78, %74 : vector<2x16x128xi1>, vector<2x16x128xf32>
    %c6_i32 = arith.constant 6 : i32
    %80 = vector.broadcast %c6_i32 : i32 to vector<2x16x128xi32>
    %81 = arith.cmpi eq, %48, %80 : vector<2x16x128xi32>
    %82 = vector.shape_cast %21 : vector<16x128xf32> to vector<1x16x128xf32>
    %83 = vector.broadcast %82 : vector<1x16x128xf32> to vector<2x16x128xf32>
    %84 = arith.select %81, %83, %79 : vector<2x16x128xi1>, vector<2x16x128xf32>
    %c7_i32 = arith.constant 7 : i32
    %85 = vector.broadcast %c7_i32 : i32 to vector<2x16x128xi32>
    %86 = arith.cmpi eq, %48, %85 : vector<2x16x128xi32>
    %87 = vector.shape_cast %24 : vector<16x128xf32> to vector<1x16x128xf32>
    %88 = vector.broadcast %87 : vector<1x16x128xf32> to vector<2x16x128xf32>
    %89 = arith.select %86, %88, %84 : vector<2x16x128xi1>, vector<2x16x128xf32>
    %c0_7 = arith.constant 0 : index
    %c0_8 = arith.constant 0 : index
    %c0_9 = arith.constant 0 : index
    %90 = vector.load %arg4[%c0_7, %c0_8, %c0_9] : memref<2x32x128xf32, #tpu.memory_space<vmem>>, vector<2x16x128xf32>
    tpu.vector_store %arg4[%c0_7, %c0_8, %c0_9], %89 {strides = array<i32>} : memref<2x32x128xf32, #tpu.memory_space<vmem>>, vector<2x16x128xf32>,
    %c0_10 = arith.constant 0 : index
    %c1 = arith.constant 1 : index
    %c0_11 = arith.constant 0 : index
    %c0_12 = arith.constant 0 : index
    %91 = vector.load %arg1[%c0_10, %c1, %c0_11, %c0_12] : memref<2x2x2x128xi32, #tpu.memory_space<vmem>>, vector<1x1x2x128xi32>
    %92 = vector.shape_cast %91 : vector<1x1x2x128xi32> to vector<2x128xi32>
    %93 = vector.shape_cast %92 : vector<2x128xi32> to vector<2x1x128xi32>
    %94 = vector.shape_cast %93 : vector<2x1x128xi32> to vector<2x1x128xi32>
    %95 = vector.broadcast %94 : vector<2x1x128xi32> to vector<2x16x128xi32>
    %cst_13 = arith.constant 0.000000e+00 : f32
    %96 = vector.broadcast %cst_13 : f32 to vector<2x16x128xf32>
    %c0_i32_14 = arith.constant 0 : i32
    %97 = vector.broadcast %c0_i32_14 : i32 to vector<2x16x128xi32>
    %98 = arith.cmpi eq, %95, %97 : vector<2x16x128xi32>
    %99 = vector.shape_cast %28 : vector<16x128xf32> to vector<1x16x128xf32>
    %100 = vector.broadcast %99 : vector<1x16x128xf32> to vector<2x16x128xf32>
    %101 = arith.select %98, %100, %96 : vector<2x16x128xi1>, vector<2x16x128xf32>
    %c1_i32_15 = arith.constant 1 : i32
    %102 = vector.broadcast %c1_i32_15 : i32 to vector<2x16x128xi32>
    %103 = arith.cmpi eq, %95, %102 : vector<2x16x128xi32>
    %104 = vector.shape_cast %31 : vector<16x128xf32> to vector<1x16x128xf32>
    %105 = vector.broadcast %104 : vector<1x16x128xf32> to vector<2x16x128xf32>
    %106 = arith.select %103, %105, %101 : vector<2x16x128xi1>, vector<2x16x128xf32>
    %c2_i32_16 = arith.constant 2 : i32
    %107 = vector.broadcast %c2_i32_16 : i32 to vector<2x16x128xi32>
    %108 = arith.cmpi eq, %95, %107 : vector<2x16x128xi32>
    %109 = vector.shape_cast %34 : vector<16x128xf32> to vector<1x16x128xf32>
    %110 = vector.broadcast %109 : vector<1x16x128xf32> to vector<2x16x128xf32>
    %111 = arith.select %108, %110, %106 : vector<2x16x128xi1>, vector<2x16x128xf32>
    %c3_i32_17 = arith.constant 3 : i32
    %112 = vector.broadcast %c3_i32_17 : i32 to vector<2x16x128xi32>
    %113 = arith.cmpi eq, %95, %112 : vector<2x16x128xi32>
    %114 = vector.shape_cast %37 : vector<16x128xf32> to vector<1x16x128xf32>
    %115 = vector.broadcast %114 : vector<1x16x128xf32> to vector<2x16x128xf32>
    %116 = arith.select %113, %115, %111 : vector<2x16x128xi1>, vector<2x16x128xf32>
    %c4_i32_18 = arith.constant 4 : i32
    %117 = vector.broadcast %c4_i32_18 : i32 to vector<2x16x128xi32>
    %118 = arith.cmpi eq, %95, %117 : vector<2x16x128xi32>
    %119 = vector.shape_cast %40 : vector<16x128xf32> to vector<1x16x128xf32>
    %120 = vector.broadcast %119 : vector<1x16x128xf32> to vector<2x16x128xf32>
    %121 = arith.select %118, %120, %116 : vector<2x16x128xi1>, vector<2x16x128xf32>
    %c5_i32_19 = arith.constant 5 : i32
    %122 = vector.broadcast %c5_i32_19 : i32 to vector<2x16x128xi32>
    %123 = arith.cmpi eq, %95, %122 : vector<2x16x128xi32>
    %124 = vector.shape_cast %43 : vector<16x128xf32> to vector<1x16x128xf32>
    %125 = vector.broadcast %124 : vector<1x16x128xf32> to vector<2x16x128xf32>
    %126 = arith.select %123, %125, %121 : vector<2x16x128xi1>, vector<2x16x128xf32>
    %c0_20 = arith.constant 0 : index
    %c16 = arith.constant 16 : index
    %c0_21 = arith.constant 0 : index
    %127 = vector.load %arg4[%c0_20, %c16, %c0_21] : memref<2x32x128xf32, #tpu.memory_space<vmem>>, vector<2x16x128xf32>
    tpu.vector_store %arg4[%c0_20, %c16, %c0_21], %126 {strides = array<i32>} : memref<2x32x128xf32, #tpu.memory_space<vmem>>, vector<2x16x128xf32>,
    %c1_22 = arith.constant 1 : index
    %c0_23 = arith.constant 0 : index
    %c0_24 = arith.constant 0 : index
    %c0_25 = arith.constant 0 : index
    %128 = vector.load %arg1[%c1_22, %c0_23, %c0_24, %c0_25] : memref<2x2x2x128xi32, #tpu.memory_space<vmem>>, vector<1x1x2x128xi32>
    %129 = vector.shape_cast %128 : vector<1x1x2x128xi32> to vector<2x128xi32>
    %130 = vector.shape_cast %129 : vector<2x128xi32> to vector<2x1x128xi32>
    %131 = vector.shape_cast %130 : vector<2x1x128xi32> to vector<2x1x128xi32>
    %132 = vector.broadcast %131 : vector<2x1x128xi32> to vector<2x16x128xi32>
    %cst_26 = arith.constant 0.000000e+00 : f32
    %133 = vector.broadcast %cst_26 : f32 to vector<2x16x128xf32>
    %c0_i32_27 = arith.constant 0 : i32
    %134 = vector.broadcast %c0_i32_27 : i32 to vector<2x16x128xi32>
    %135 = arith.cmpi eq, %132, %134 : vector<2x16x128xi32>
    %136 = vector.shape_cast %3 : vector<16x128xf32> to vector<1x16x128xf32>
    %137 = vector.broadcast %136 : vector<1x16x128xf32> to vector<2x16x128xf32>
    %138 = arith.select %135, %137, %133 : vector<2x16x128xi1>, vector<2x16x128xf32>
    %c1_i32_28 = arith.constant 1 : i32
    %139 = vector.broadcast %c1_i32_28 : i32 to vector<2x16x128xi32>
    %140 = arith.cmpi eq, %132, %139 : vector<2x16x128xi32>
    %141 = vector.shape_cast %6 : vector<16x128xf32> to vector<1x16x128xf32>
    %142 = vector.broadcast %141 : vector<1x16x128xf32> to vector<2x16x128xf32>
    %143 = arith.select %140, %142, %138 : vector<2x16x128xi1>, vector<2x16x128xf32>
    %c2_i32_29 = arith.constant 2 : i32
    %144 = vector.broadcast %c2_i32_29 : i32 to vector<2x16x128xi32>
    %145 = arith.cmpi eq, %132, %144 : vector<2x16x128xi32>
    %146 = vector.shape_cast %9 : vector<16x128xf32> to vector<1x16x128xf32>
    %147 = vector.broadcast %146 : vector<1x16x128xf32> to vector<2x16x128xf32>
    %148 = arith.select %145, %147, %143 : vector<2x16x128xi1>, vector<2x16x128xf32>
    %c3_i32_30 = arith.constant 3 : i32
    %149 = vector.broadcast %c3_i32_30 : i32 to vector<2x16x128xi32>
    %150 = arith.cmpi eq, %132, %149 : vector<2x16x128xi32>
    %151 = vector.shape_cast %12 : vector<16x128xf32> to vector<1x16x128xf32>
    %152 = vector.broadcast %151 : vector<1x16x128xf32> to vector<2x16x128xf32>
    %153 = arith.select %150, %152, %148 : vector<2x16x128xi1>, vector<2x16x128xf32>
    %c4_i32_31 = arith.constant 4 : i32
    %154 = vector.broadcast %c4_i32_31 : i32 to vector<2x16x128xi32>
    %155 = arith.cmpi eq, %132, %154 : vector<2x16x128xi32>
    %156 = vector.shape_cast %15 : vector<16x128xf32> to vector<1x16x128xf32>
    %157 = vector.broadcast %156 : vector<1x16x128xf32> to vector<2x16x128xf32>
    %158 = arith.select %155, %157, %153 : vector<2x16x128xi1>, vector<2x16x128xf32>
    %c5_i32_32 = arith.constant 5 : i32
    %159 = vector.broadcast %c5_i32_32 : i32 to vector<2x16x128xi32>
    %160 = arith.cmpi eq, %132, %159 : vector<2x16x128xi32>
    %161 = vector.shape_cast %18 : vector<16x128xf32> to vector<1x16x128xf32>
    %162 = vector.broadcast %161 : vector<1x16x128xf32> to vector<2x16x128xf32>
    %163 = arith.select %160, %162, %158 : vector<2x16x128xi1>, vector<2x16x128xf32>
    %c6_i32_33 = arith.constant 6 : i32
    %164 = vector.broadcast %c6_i32_33 : i32 to vector<2x16x128xi32>
    %165 = arith.cmpi eq, %132, %164 : vector<2x16x128xi32>
    %166 = vector.shape_cast %21 : vector<16x128xf32> to vector<1x16x128xf32>
    %167 = vector.broadcast %166 : vector<1x16x128xf32> to vector<2x16x128xf32>
    %168 = arith.select %165, %167, %163 : vector<2x16x128xi1>, vector<2x16x128xf32>
    %c7_i32_34 = arith.constant 7 : i32
    %169 = vector.broadcast %c7_i32_34 : i32 to vector<2x16x128xi32>
    %170 = arith.cmpi eq, %132, %169 : vector<2x16x128xi32>
    %171 = vector.shape_cast %24 : vector<16x128xf32> to vector<1x16x128xf32>
    %172 = vector.broadcast %171 : vector<1x16x128xf32> to vector<2x16x128xf32>
    %173 = arith.select %170, %172, %168 : vector<2x16x128xi1>, vector<2x16x128xf32>
    %c0_35 = arith.constant 0 : index
    %c0_36 = arith.constant 0 : index
    %c0_37 = arith.constant 0 : index
    %174 = vector.load %arg5[%c0_35, %c0_36, %c0_37] : memref<2x32x128xf32, #tpu.memory_space<vmem>>, vector<2x16x128xf32>
    tpu.vector_store %arg5[%c0_35, %c0_36, %c0_37], %173 {strides = array<i32>} : memref<2x32x128xf32, #tpu.memory_space<vmem>>, vector<2x16x128xf32>,
    %c1_38 = arith.constant 1 : index
    %c1_39 = arith.constant 1 : index
    %c0_40 = arith.constant 0 : index
    %c0_41 = arith.constant 0 : index
    %175 = vector.load %arg1[%c1_38, %c1_39, %c0_40, %c0_41] : memref<2x2x2x128xi32, #tpu.memory_space<vmem>>, vector<1x1x2x128xi32>
    %176 = vector.shape_cast %175 : vector<1x1x2x128xi32> to vector<2x128xi32>
    %177 = vector.shape_cast %176 : vector<2x128xi32> to vector<2x1x128xi32>
    %178 = vector.shape_cast %177 : vector<2x1x128xi32> to vector<2x1x128xi32>
    %179 = vector.broadcast %178 : vector<2x1x128xi32> to vector<2x16x128xi32>
    %cst_42 = arith.constant 0.000000e+00 : f32
    %180 = vector.broadcast %cst_42 : f32 to vector<2x16x128xf32>
    %c0_i32_43 = arith.constant 0 : i32
    %181 = vector.broadcast %c0_i32_43 : i32 to vector<2x16x128xi32>
    %182 = arith.cmpi eq, %179, %181 : vector<2x16x128xi32>
    %183 = vector.shape_cast %28 : vector<16x128xf32> to vector<1x16x128xf32>
    %184 = vector.broadcast %183 : vector<1x16x128xf32> to vector<2x16x128xf32>
    %185 = arith.select %182, %184, %180 : vector<2x16x128xi1>, vector<2x16x128xf32>
    %c1_i32_44 = arith.constant 1 : i32
    %186 = vector.broadcast %c1_i32_44 : i32 to vector<2x16x128xi32>
    %187 = arith.cmpi eq, %179, %186 : vector<2x16x128xi32>
    %188 = vector.shape_cast %31 : vector<16x128xf32> to vector<1x16x128xf32>
    %189 = vector.broadcast %188 : vector<1x16x128xf32> to vector<2x16x128xf32>
    %190 = arith.select %187, %189, %185 : vector<2x16x128xi1>, vector<2x16x128xf32>
    %c2_i32_45 = arith.constant 2 : i32
    %191 = vector.broadcast %c2_i32_45 : i32 to vector<2x16x128xi32>
    %192 = arith.cmpi eq, %179, %191 : vector<2x16x128xi32>
    %193 = vector.shape_cast %34 : vector<16x128xf32> to vector<1x16x128xf32>
    %194 = vector.broadcast %193 : vector<1x16x128xf32> to vector<2x16x128xf32>
    %195 = arith.select %192, %194, %190 : vector<2x16x128xi1>, vector<2x16x128xf32>
    %c3_i32_46 = arith.constant 3 : i32
    %196 = vector.broadcast %c3_i32_46 : i32 to vector<2x16x128xi32>
    %197 = arith.cmpi eq, %179, %196 : vector<2x16x128xi32>
    %198 = vector.shape_cast %37 : vector<16x128xf32> to vector<1x16x128xf32>
    %199 = vector.broadcast %198 : vector<1x16x128xf32> to vector<2x16x128xf32>
    %200 = arith.select %197, %199, %195 : vector<2x16x128xi1>, vector<2x16x128xf32>
    %c4_i32_47 = arith.constant 4 : i32
    %201 = vector.broadcast %c4_i32_47 : i32 to vector<2x16x128xi32>
    %202 = arith.cmpi eq, %179, %201 : vector<2x16x128xi32>
    %203 = vector.shape_cast %40 : vector<16x128xf32> to vector<1x16x128xf32>
    %204 = vector.broadcast %203 : vector<1x16x128xf32> to vector<2x16x128xf32>
    %205 = arith.select %202, %204, %200 : vector<2x16x128xi1>, vector<2x16x128xf32>
    %c5_i32_48 = arith.constant 5 : i32
    %206 = vector.broadcast %c5_i32_48 : i32 to vector<2x16x128xi32>
    %207 = arith.cmpi eq, %179, %206 : vector<2x16x128xi32>
    %208 = vector.shape_cast %43 : vector<16x128xf32> to vector<1x16x128xf32>
    %209 = vector.broadcast %208 : vector<1x16x128xf32> to vector<2x16x128xf32>
    %210 = arith.select %207, %209, %205 : vector<2x16x128xi1>, vector<2x16x128xf32>
    %c0_49 = arith.constant 0 : index
    %c16_50 = arith.constant 16 : index
    %c0_51 = arith.constant 0 : index
    %211 = vector.load %arg5[%c0_49, %c16_50, %c0_51] : memref<2x32x128xf32, #tpu.memory_space<vmem>>, vector<2x16x128xf32>
    tpu.vector_store %arg5[%c0_49, %c16_50, %c0_51], %210 {strides = array<i32>} : memref<2x32x128xf32, #tpu.memory_space<vmem>>, vector<2x16x128xf32>,
    return
  }
  func.func @transform_0(%arg0: i32) -> (i32, i32, i32, i32) {
    %c0_i32 = arith.constant 0 : i32
    %c0_i32_0 = arith.constant 0 : i32
    %c0_i32_1 = arith.constant 0 : i32
    %c0_i32_2 = arith.constant 0 : i32
    return %c0_i32, %c0_i32_0, %c0_i32_1, %arg0 : i32, i32, i32, i32
  }
  func.func @transform_1(%arg0: i32) -> (i32, i32) {
    %c0_i32 = arith.constant 0 : i32
    %c0_i32_0 = arith.constant 0 : i32
    %c0_i32_1 = arith.constant 0 : i32
    return %c0_i32, %c0_i32_0 : i32, i32
  }
  func.func @transform_2(%arg0: i32) -> (i32, i32) {
    %c0_i32 = arith.constant 0 : i32
    %c0_i32_0 = arith.constant 0 : i32
    %c0_i32_1 = arith.constant 0 : i32
    return %c0_i32, %c0_i32_0 : i32, i32
  }
  func.func @transform_3(%arg0: i32) -> (i32, i32, i32) {
    %c0_i32 = arith.constant 0 : i32
    %c0_i32_0 = arith.constant 0 : i32
    %c0_i32_1 = arith.constant 0 : i32
    return %c0_i32, %c0_i32_0, %arg0 : i32, i32, i32
  }
  func.func @transform_4(%arg0: i32) -> (i32, i32, i32) {
    %c0_i32 = arith.constant 0 : i32
    %c0_i32_0 = arith.constant 0 : i32
    %c0_i32_1 = arith.constant 0 : i32
    return %c0_i32, %c0_i32_0, %arg0 : i32, i32, i32
  }
}

</mosaic_0001>

<bundles_post_ra>
// kernel: tpu_custom_call.1
= control target key start
LH: loop header
LB: loop body
LE: loop exit
PB: predicated region body
PF: predicated region fallthrough
CT: control target
= control target key end

     0   :  { %10 = vsyncpa [#allocation3], 0  ;;  %v570_v1 = vmov 2   ;;  %v571_v2 = vmov 1   ;;  %s1085_s0 = inlined_call_operand.vmem [shape: s32[2,2,2,128], index: 0, kind: input, shape index: {}]   ;;  %s1086_s1 = inlined_call_operand.vmem [shape: f32[16,8], index: 1, kind: input, shape index: {}]   ;;  %s1087_s2 = inlined_call_operand.vmem [shape: f32[16,6], index: 2, kind: input, shape index: {}]   ;;  %s1088_s3 = inlined_call_operand.hbm [shape: f32[2,32,128], index: 3, kind: output, shape index: {0}]   ;;  %s1089_s4 = inlined_call_operand.hbm [shape: f32[2,32,128], index: 4, kind: output, shape index: {1}]  }
   0x1   :  { %v18_v0 = vld [vmem:[%s1086_s1] sm:$0xff]  ;;  %502 = vset.pattern.permute.xlu0 %v570_v1  ;;  %501 = vset.pattern.permute.xlu1 %v571_v2  ;;  %v19_v3 = vld [vmem:[%s1086_s1 + $0x8] sm:$0xff] }
   0x2   :  { %86 = vperm.xlu0 %502, %v18_v0   ;;  %72 = vperm.xlu1 %501, %v18_v0  }
   0x3   :  { %11 = vsyncpa [#allocation5], 0  ;;  %v572_v4 = vmov 0   ;;  %v20_v5 = vld [vmem:[%s1087_s2] sm:$0xff]  ;;  %v573_v6 = vmov 3   ;;  %v21_v7 = vld [vmem:[%s1087_s2 + $0x8] sm:$0xff]  ;;  %v34_v22 = vlaneseq }
   0x4   :  { %v574_v8 = vmov 4   ;;  %v575_v9 = vmov 5   ;;  %v576_v10 = vmov 7   ;;  %v577_v11 = vmov 6   ;;  %s580_s30 = smov [#allocation4]  }
   0x5   :  { %v578_v20 = vmov 1966171168   ;;  %v35_v26 = vshrl.u32 %v34_v22, 7  ;;  %s466_s5 = sshll.u32 %s580_s30, 4  ;;  %s1054_s5 = int_to_ptr.vmem [resolvable:$true] %s466_s5 }
   0x6   :  { %503 = vset.pattern.permute.xlu0 %v572_v4  ;;  %76 = vperm.xlu1 %501, %v19_v3   ;;  %v32_v21 = vunpack.c.l.s4 %v578_v20  ;;  %v481_v27 = vld.sshfl [vmem:[%s1085_s0] sm:$0x11 pattern:$0x75316420] }
   0x7   :  { %57 = vperm.xlu0 %503, %v18_v0   ;;  %v485_v29 = vld.sshfl [vmem:[%s1085_s0 + $0x4] sm:$0x11 pattern:$0x75316420]  ;;  %v30_v30 = vcombine.high %v481_v27, %v481_v27  ;;  %v47_v37 = vsub.s32 0, %v35_v26 }
   0x8   :  { %v33_v25 = vunpack.c.0.s8 %v32_v21  ;;  %v302_v33 = vcombine.high %v485_v29, %v485_v29  ;;  %v483_v41 = vld.sshfl [vmem:[%s1085_s0 + $0x2] sm:$0x11 pattern:$0x75316420] }
   0x9   :  { %v487_v42 = vld.sshfl [vmem:[%s1085_s0 + $0x6] sm:$0x11 pattern:$0x75316420]  ;;  %v180_v49 = vcombine.high %v483_v41, %v483_v41  ;;  %s579_s0 = smov [#allocation2]  }
   0xa   :  { %504 = vset.pattern.permute.xlu1 %v570_v1  ;;  %v36_v31 = vsub.s32 %v33_v25, %v35_v26  ;;  %v386_v50 = vcombine.high %v487_v42, %v487_v42  ;;  %s454_s29 = sshll.u32 %s579_s0, 4  ;;  %s455_s29 = int_to_ptr.vmem [resolvable:$true] %s454_s29 }
   0xb   :  { %62 = vperm.xlu0 %503, %v19_v3   ;;  %90 = vperm.xlu1 %504, %v19_v3   ;;  %s522_s6 = scalar_lea.vmem %s455_s29, 1024  ;;  %p527_p1 = scmp.lt.s32.totalorder %s455_s29, %s455_s29 }
   0xc   :  { %v37_v35 = vrot.slane %v481_v27, %v36_v31  ;;  %v44_v36 = vrot.slane %v30_v30, %v36_v31  ;;  %v309_v38 = vrot.slane %v485_v29, %v36_v31  ;;  %v316_v39 = vrot.slane %v302_v33, %v36_v31  ;;  %p523_p0 = scmp.ne.s32.totalorder %s455_s29, %s522_s6  ;;  %p528_p2 = scmp.lt.s32.totalorder %s522_s6, %s522_s6 }
   0xd   :  { %v187_v51 = vrot.slane %v483_v41, %v36_v31  ;;  %v194_v52 = vrot.slane %v180_v49, %v36_v31  ;;  %v393_v53 = vrot.slane %v487_v42, %v36_v31  ;;  %v400_v54 = vrot.slane %v386_v50, %v36_v31 }
   0xe   :  { %v658_v43 = vrot.slane %v37_v35, %v47_v37  ;;  %v660_v44 = vrot.slane %v44_v36, %v47_v37  ;;  %v662_v45 = vrot.slane %v309_v38, %v47_v37  ;;  %v664_v46 = vrot.slane %v316_v39, %v47_v37  ;;  %p529_p3 = por %p528_p2, %p527_p1 }
   0xf   :  { %207 = vperm.xlu0 %503, %v20_v5   ;;  %505 = vset.pattern.permute.xlu1 %v573_v6  ;;  %v696_v61 = vrot.slane %v187_v51, %v47_v37  ;;  %v698_v62 = vrot.slane %v194_v52, %v47_v37  ;;  %v700_v63 = vrot.slane %v393_v53, %v47_v37 }
  0x10   :  { %100 = vperm.xlu1 %505, %v18_v0   ;;  %vm53_vm0 = vcmp.eq.s32.totalorder %v658_v43, 0  ;;  %vm54_vm1 = vcmp.eq.s32.totalorder %v660_v44, 0  ;;  %vm69_vm2 = vcmp.eq.s32.totalorder %v658_v43, 1  ;;  %vm70_vm3 = vcmp.eq.s32.totalorder %v660_v44, 1  ;;  %p530_p4 = pnand %p529_p3, %p523_p0 }
  0x11   :  { %vm325_vm4 = vcmp.eq.s32.totalorder %v662_v45, 0  ;;  %vm326_vm5 = vcmp.eq.s32.totalorder %v664_v46, 0  ;;  %vm331_vm6 = vcmp.eq.s32.totalorder %v662_v45, 1  ;;  %vm332_vm7 = vcmp.eq.s32.totalorder %v664_v46, 1 }
  0x12   :  { %vm83_vm8 = vcmp.eq.s32.totalorder %v658_v43, 2  ;;  %vm84_vm9 = vcmp.eq.s32.totalorder %v660_v44, 2  ;;  %vm337_vm10 = vcmp.eq.s32.totalorder %v662_v45, 2  ;;  %vm338_vm11 = vcmp.eq.s32.totalorder %v664_v46, 2 }
  0x13   :  { %509 = vset.pattern.permute.xlu0 %v571_v2  ;;  %vm111_vm15 = vcmp.eq.s32.totalorder %v658_v43, 4  ;;  %vm125_vm13 = vcmp.eq.s32.totalorder %v658_v43, 5  ;;  %vm126_vm12 = vcmp.eq.s32.totalorder %v660_v44, 5  ;;  %vm355_vm14 = vcmp.eq.s32.totalorder %v662_v45, 5 }
  0x14   :  { %226 = vperm.xlu0 %509, %v21_v7   ;;  %506 = vset.pattern.permute.xlu1 %v574_v8 }
  0x15   :  { %114 = vperm.xlu1 %506, %v18_v0  }
  0x18   :  { %511 = vset.pattern.permute.xlu0 %v575_v9 }
  0x19   :  { %128 = vperm.xlu0 %511, %v18_v0   ;;  %118 = vperm.xlu1 %506, %v19_v3  }
  0x1d   :  { %512 = vset.pattern.permute.xlu0 %v573_v6  ;;  %507 = vset.pattern.permute.xlu1 %v572_v4 }
  0x1e   :  { %104 = vperm.xlu0 %512, %v19_v3   ;;  %212 = vperm.xlu1 %507, %v21_v7  }
  0x22   :  { %508 = vset.pattern.permute.xlu1 %v571_v2  ;;  %254 = vperm.xlu0 %512, %v21_v7  }
  0x23   :  { %222 = vperm.xlu1 %508, %v20_v5  }
  0x26   :  { %516 = vset.pattern.permute.xlu0 %v574_v8 }
  0x27   :  { %510 = vset.pattern.permute.xlu1 %v570_v1  ;;  %264 = vperm.xlu0 %516, %v20_v5  }
  0x28   :  { %236 = vperm.xlu1 %510, %v20_v5  }
  0x2b   :  { %519 = vset.pattern.permute.xlu0 %v576_v10 }
  0x2c   :  { %240 = vperm.xlu1 %510, %v21_v7   ;;  %160 = vperm.xlu0 %519, %v19_v3  }
  0x30   :  { %513 = vset.pattern.permute.xlu1 %v575_v9  ;;  %521 = vset.pattern.permute.xlu0 %v575_v9 }
  0x31   :  { %132 = vperm.xlu1 %513, %v19_v3  }
  0x35   :  { %514 = vset.pattern.permute.xlu1 %v573_v6 }
  0x36   :  { %250 = vperm.xlu1 %514, %v20_v5  }
  0x3a   :  { %515 = vset.pattern.permute.xlu1 %v577_v11 }
  0x3b   :  { %142 = vperm.xlu1 %515, %v18_v0  }
  0x3f   :  { %146 = vperm.xlu1 %515, %v19_v3  }
  0x43   :  { %517 = vset.pattern.permute.xlu1 %v574_v8 }
  0x44   :  { %268 = vperm.xlu1 %517, %v21_v7  }
  0x48   :  { %518 = vset.pattern.permute.xlu1 %v576_v10 }
  0x49   :  { %156 = vperm.xlu1 %518, %v18_v0   ;;  %v702_v0 = vrot.slane %v400_v54, %v47_v37 }
  0x4d   :  { %520 = vset.pattern.permute.xlu1 %v575_v9 }
  0x4e   :  { %278 = vperm.xlu1 %520, %v20_v5  }
  0x52   :  { %282 = vperm.xlu1 %520, %v21_v7  }
  0x81   :  { %v620_v12 = vpop.permute.xlu1 %72  ;;  %v626_v15 = vpop.permute.xlu0 %86 }
  0x85   :  { %v622_v13 = vpop.permute.xlu1 %76 }
  0x86   :  { %v632_v18 = vpop.permute.xlu0 %57 }
  0x87   :  { %v65_v1 = vsel %vm53_vm0, %v632_v18, 0.0  ;;  %v67_v2 = vsel %vm54_vm1, %v632_v18, 0.0  ;;  %v327_v3 = vsel %vm325_vm4, %v632_v18, 0.0  ;;  %v329_v4 = vsel %vm326_vm5, %v632_v18, 0.0 }
  0x88   :  { %v79_v11 = vsel %vm69_vm2, %v620_v12, %v65_v1  ;;  %v81_v18 = vsel %vm70_vm3, %v620_v12, %v67_v2  ;;  %v335_v20 = vsel %vm332_vm7, %v620_v12, %v329_v4 }
  0x89   :  { %v95_v33 = vsel %vm84_vm9, %v626_v15, %v81_v18  ;;  %v341_v36 = vsel %vm338_vm11, %v626_v15, %v335_v20 }
  0x8a   :  { %v624_v14 = vpop.permute.xlu1 %90  ;;  %v63_v23 = vpop.permute.xlu0 %62 }
  0x8b   :  { %v66_v57 = vsel %vm53_vm0, %v63_v23, 0.0  ;;  %v68_v58 = vsel %vm54_vm1, %v63_v23, 0.0  ;;  %v328_v59 = vsel %vm325_vm4, %v63_v23, 0.0  ;;  %v330_v60 = vsel %vm326_vm5, %v63_v23, 0.0 }
  0x8c   :  { %v80_v7 = vsel %vm69_vm2, %v622_v13, %v66_v57  ;;  %v82_v8 = vsel %vm70_vm3, %v622_v13, %v68_v58  ;;  %v334_v9 = vsel %vm331_vm6, %v622_v13, %v328_v59  ;;  %v336_v10 = vsel %vm332_vm7, %v622_v13, %v330_v60 }
  0x8d   :  { %v333_v13 = vsel %vm331_vm6, %v620_v12, %v327_v3  ;;  %v94_v21 = vsel %vm83_vm8, %v624_v14, %v80_v7  ;;  %v96_v22 = vsel %vm84_vm9, %v624_v14, %v82_v8  ;;  %v340_v12 = vsel %vm337_vm10, %v624_v14, %v334_v9 }
  0x8e   :  { %v641_v28 = vpop.permute.xlu0 %207  ;;  %v342_v23 = vsel %vm338_vm11, %v624_v14, %v336_v10  ;;  %vm1092_vm3 = vcmp.eq.s32.totalorder %v658_v43, 3  ;;  %vm1093_vm6 = vcmp.eq.s32.totalorder %v660_v44, 3  ;;  %vm1094_vm7 = vcmp.eq.s32.totalorder %v662_v45, 3 }
  0x8f   :  { %v628_v16 = vpop.permute.xlu1 %100  ;;  %vm1095_vm2 = vcmp.eq.s32.totalorder %v664_v46, 3  ;;  %vm153_vm4 = vcmp.eq.s32.totalorder %v658_v43, 7  ;;  %vm1091_vm0 = vcmp.eq.s32.totalorder %v660_v44, 7  ;;  %vm1090_vm5 = vcmp.eq.s32.totalorder %v662_v45, 7 }
  0x90   :  { %v93_v14 = vsel %vm83_vm8, %v626_v15, %v79_v11  ;;  %v339_v35 = vsel %vm337_vm10, %v626_v15, %v333_v13  ;;  %vm220_vm9 = vcmp.eq.s32.totalorder %v698_v62, 1  ;;  %vm415_vm1 = vcmp.eq.s32.totalorder %v700_v63, 1 }
  0x91   :  { %vm416_vm10 = vcmp.eq.s32.totalorder %v702_v0, 1  ;;  %vm1096_vm11 = vcmp.eq.s32.totalorder %v660_v44, 4  ;;  %vm1098_vm8 = vcmp.eq.s32.totalorder %v664_v46, 4 }
  0x93   :  { %v648_v34 = vpop.permute.xlu0 %226 }
  0x94   :  { %v630_v17 = vpop.permute.xlu1 %114 }
  0x98   :  { %v634_v19 = vpop.permute.xlu1 %118  ;;  %v666_v47 = vpop.permute.xlu0 %128 }
  0x9d   :  { %v636_v24 = vpop.permute.xlu1 %212  ;;  %v105_v56 = vpop.permute.xlu0 %104 }
  0x9e   :  { %v108_v26 = vsel %vm1092_vm3, %v105_v56, %v94_v21  ;;  %v110_v27 = vsel %vm1093_vm6, %v105_v56, %v96_v22  ;;  %v346_v29 = vsel %vm1094_vm7, %v105_v56, %v340_v12  ;;  %v348_v30 = vsel %vm1095_vm2, %v105_v56, %v342_v23 }
  0x9f   :  { %vm219_vm7 = vcmp.eq.s32.totalorder %v696_v61, 1  ;;  %v122_v15 = vsel %vm111_vm15, %v634_v19, %v108_v26  ;;  %v124_v37 = vsel %vm1096_vm11, %v634_v19, %v110_v27  ;;  %vm1097_vm6 = vcmp.eq.s32.totalorder %v662_v45, 4 }
  0xa0   :  { %v352_v38 = vsel %vm1097_vm6, %v634_v19, %v346_v29  ;;  %v354_v39 = vsel %vm1098_vm8, %v634_v19, %v348_v30  ;;  %vm1099_vm6 = vcmp.eq.s32.totalorder %v664_v46, 5  ;;  %vm1100_vm8 = vcmp.eq.s32.totalorder %v658_v43, 6 }
  0xa1   :  { %v724_v5 = vpop.permute.xlu0 %254  ;;  %vm1101_vm11 = vcmp.eq.s32.totalorder %v660_v44, 6  ;;  %vm1102_vm3 = vcmp.eq.s32.totalorder %v662_v45, 6  ;;  %vm1103_vm2 = vcmp.eq.s32.totalorder %v664_v46, 6 }
  0xa2   :  { %v646_v32 = vpop.permute.xlu1 %222 }
  0xa6   :  { %v772_v25 = vpop.permute.xlu0 %264 }
  0xa7   :  { %v650_v40 = vpop.permute.xlu1 %236 }
  0xab   :  { %v668_v48 = vpop.permute.xlu1 %240  ;;  %v161_v41 = vpop.permute.xlu0 %160 }
  0xb0   :  { %v678_v55 = vpop.permute.xlu1 %132 }
  0xb1   :  { %v136_v42 = vsel %vm125_vm13, %v678_v55, %v122_v15  ;;  %v138_v49 = vsel %vm126_vm12, %v678_v55, %v124_v37  ;;  %v358_v50 = vsel %vm355_vm14, %v678_v55, %v352_v38  ;;  %v360_v51 = vsel %vm1099_vm6, %v678_v55, %v354_v39 }
  0xb2   :  { %vm1104_vm6 = vcmp.eq.s32.totalorder %v664_v46, 7 }
  0xb5   :  { %v726_v6 = vpop.permute.xlu1 %250 }
  0xba   :  { %v782_v31 = vpop.permute.xlu1 %142 }
  0xbe   :  { %v147_v52 = vpop.permute.xlu1 %146 }
  0xbf   :  { %v150_v19 = vsel %vm1100_vm8, %v147_v52, %v136_v42  ;;  %v152_v53 = vsel %vm1101_vm11, %v147_v52, %v138_v49  ;;  %v364_v54 = vsel %vm1102_vm3, %v147_v52, %v358_v50  ;;  %v366_v56 = vsel %vm1103_vm2, %v147_v52, %v360_v51 }
  0xc0   :  { %v164_v57 = vsel %vm153_vm4, %v161_v41, %v150_v19  ;;  %v166_v58 = vsel %vm1091_vm0, %v161_v41, %v152_v53  ;;  %v370_v55 = vsel %vm1090_vm5, %v161_v41, %v364_v54  ;;  %v372_v59 = vsel %vm1104_vm6, %v161_v41, %v366_v56 }
  0xc1   :  { %vm1105_vm8 = vcmp.eq.s32.totalorder %v696_v61, 0  ;;  %vm1106_vm3 = vcmp.eq.s32.totalorder %v698_v62, 0  ;;  %vm1107_vm2 = vcmp.eq.s32.totalorder %v700_v63, 0  ;;  %vm1108_vm11 = vcmp.eq.s32.totalorder %v702_v0, 0  ;;  %168 = vst [vmem:[#allocation2 + $0x8] sm:$0xff] %v164_v57  ;;  %170 = vst [vmem:[#allocation2 + $0x28] sm:$0xff] %v166_v58 }
  0xc2   :  { %v215_v60 = vsel %vm1105_vm8, %v641_v28, 0.0  ;;  %v217_v1 = vsel %vm1106_vm3, %v641_v28, 0.0  ;;  %v411_v2 = vsel %vm1107_vm2, %v641_v28, 0.0  ;;  %v413_v3 = vsel %vm1108_vm11, %v641_v28, 0.0  ;;  %374 = vst [vmem:[#allocation4 + $0x8] sm:$0xff] %v370_v55  ;;  %376 = vst [vmem:[#allocation4 + $0x28] sm:$0xff] %v372_v59 }
  0xc3   :  { %vm1109_vm3 = vcmp.eq.s32.totalorder %v658_v43, 3  ;;  %vm1110_vm2 = vcmp.eq.s32.totalorder %v660_v44, 3  ;;  %vm1111_vm11 = vcmp.eq.s32.totalorder %v662_v45, 3  ;;  %vm1112_vm0 = vcmp.eq.s32.totalorder %v664_v46, 3  ;;  %v892_v18 = vpop.permute.xlu1 %268 }
  0xc4   :  { %v107_v4 = vsel %vm1109_vm3, %v628_v16, %v93_v14  ;;  %v109_v28 = vsel %vm1110_vm2, %v628_v16, %v95_v33  ;;  %v345_v7 = vsel %vm1111_vm11, %v628_v16, %v339_v35  ;;  %v347_v8 = vsel %vm1112_vm0, %v628_v16, %v341_v36 }
  0xc5   :  { %vm261_vm8 = vcmp.eq.s32.totalorder %v696_v61, 4  ;;  %v121_v9 = vsel %vm111_vm15, %v630_v17, %v107_v4  ;;  %vm1113_vm2 = vcmp.eq.s32.totalorder %v660_v44, 4  ;;  %vm1114_vm11 = vcmp.eq.s32.totalorder %v662_v45, 4 }
  0xc6   :  { %v123_v10 = vsel %vm1113_vm2, %v630_v17, %v109_v28  ;;  %v351_v16 = vsel %vm1114_vm11, %v630_v17, %v345_v7  ;;  %vm1115_vm0 = vcmp.eq.s32.totalorder %v664_v46, 4  ;;  %vm275_vm3 = vcmp.eq.s32.totalorder %v696_v61, 5 }
  0xc7   :  { %v353_v11 = vsel %vm1115_vm0, %v630_v17, %v347_v8  ;;  %vm276_vm5 = vcmp.eq.s32.totalorder %v698_v62, 5  ;;  %vm439_vm15 = vcmp.eq.s32.totalorder %v700_v63, 5  ;;  %vm440_vm6 = vcmp.eq.s32.totalorder %v702_v0, 5 }
  0xc8   :  { %v135_v13 = vsel %vm125_vm13, %v666_v47, %v121_v9  ;;  %v137_v20 = vsel %vm126_vm12, %v666_v47, %v123_v10  ;;  %v357_v17 = vsel %vm355_vm14, %v666_v47, %v351_v16  ;;  %vm1116_vm2 = vcmp.eq.s32.totalorder %v664_v46, 5  ;;  %v157_v38 = vpop.permute.xlu1 %156 }
  0xc9   :  { %v359_v21 = vsel %vm1116_vm2, %v666_v47, %v353_v11  ;;  %vm1117_vm11 = vcmp.eq.s32.totalorder %v696_v61, 0  ;;  %vm1118_vm0 = vcmp.eq.s32.totalorder %v698_v62, 0  ;;  %vm1119_vm13 = vcmp.eq.s32.totalorder %v700_v63, 0 }
  0xca   :  { %v216_v22 = vsel %vm1117_vm11, %v636_v24, 0.0  ;;  %v218_v12 = vsel %vm1118_vm0, %v636_v24, 0.0  ;;  %v412_v23 = vsel %vm1119_vm13, %v636_v24, 0.0  ;;  %vm1120_vm12 = vcmp.eq.s32.totalorder %v702_v0, 0 }
  0xcb   :  { %v414_v26 = vsel %vm1120_vm12, %v636_v24, 0.0  ;;  %v229_v47 = vsel %vm219_vm7, %v646_v32, %v215_v60  ;;  %v231_v27 = vsel %vm220_vm9, %v646_v32, %v217_v1  ;;  %v417_v29 = vsel %vm415_vm1, %v646_v32, %v411_v2 }
  0xcc   :  { %v419_v30 = vsel %vm416_vm10, %v646_v32, %v413_v3  ;;  %vm1121_vm14 = vcmp.eq.s32.totalorder %v696_v61, 2  ;;  %vm1122_vm2 = vcmp.eq.s32.totalorder %v698_v62, 2  ;;  %vm1123_vm11 = vcmp.eq.s32.totalorder %v700_v63, 2 }
  0xcd   :  { %v243_v24 = vsel %vm1121_vm14, %v650_v40, %v229_v47  ;;  %v245_v14 = vsel %vm1122_vm2, %v650_v40, %v231_v27  ;;  %v423_v33 = vsel %vm1123_vm11, %v650_v40, %v417_v29  ;;  %vm1124_vm0 = vcmp.eq.s32.totalorder %v702_v0, 2  ;;  %v279_v58 = vpop.permute.xlu1 %278 }
  0xce   :  { %v425_v35 = vsel %vm1124_vm0, %v650_v40, %v419_v30  ;;  %vm1125_vm13 = vcmp.eq.s32.totalorder %v658_v43, 6  ;;  %vm1126_vm12 = vcmp.eq.s32.totalorder %v660_v44, 6  ;;  %vm1127_vm14 = vcmp.eq.s32.totalorder %v662_v45, 6 }
  0xcf   :  { %v149_v32 = vsel %vm1125_vm13, %v782_v31, %v135_v13  ;;  %v151_v36 = vsel %vm1126_vm12, %v782_v31, %v137_v20  ;;  %v363_v15 = vsel %vm1127_vm14, %v782_v31, %v357_v17  ;;  %vm1128_vm2 = vcmp.eq.s32.totalorder %v664_v46, 6 }
  0xd0   :  { %v365_v37 = vsel %vm1128_vm2, %v782_v31, %v359_v21  ;;  %v163_v40 = vsel %vm153_vm4, %v157_v38, %v149_v32  ;;  %vm1129_vm11 = vcmp.eq.s32.totalorder %v660_v44, 7  ;;  %vm1130_vm0 = vcmp.eq.s32.totalorder %v662_v45, 7 }
  0xd1   :  { %v165_v39 = vsel %vm1129_vm11, %v157_v38, %v151_v36  ;;  %v369_v41 = vsel %vm1130_vm0, %v157_v38, %v363_v15  ;;  %vm1131_vm13 = vcmp.eq.s32.totalorder %v664_v46, 7  ;;  %vm1132_vm12 = vcmp.eq.s32.totalorder %v696_v61, 3  ;;  %167 = vst [vmem:[#allocation2] sm:$0xff] %v163_v40  ;;  %v283_v9 = vpop.permute.xlu1 %282 }
  0xd2   :  { %v371_v42 = vsel %vm1131_vm13, %v157_v38, %v365_v37  ;;  %v257_v49 = vsel %vm1132_vm12, %v726_v6, %v243_v24  ;;  %vm1133_vm14 = vcmp.eq.s32.totalorder %v698_v62, 3  ;;  %vm1134_vm4 = vcmp.eq.s32.totalorder %v700_v63, 3  ;;  %169 = vst [vmem:[#allocation2 + $0x20] sm:$0xff] %v165_v39  ;;  %373 = vst [vmem:[#allocation4] sm:$0xff] %v369_v41 }
  0xd3   :  { %v259_v31 = vsel %vm1133_vm14, %v726_v6, %v245_v14  ;;  %v429_v43 = vsel %vm1134_vm4, %v726_v6, %v423_v33  ;;  %vm1135_vm2 = vcmp.eq.s32.totalorder %v702_v0, 3  ;;  %375 = vst [vmem:[#allocation4 + $0x20] sm:$0xff] %v371_v42  ;;  %v230_v45 = vsel %vm219_vm7, %v648_v34, %v216_v22 }
  0xd4   :  { %v431_v44 = vsel %vm1135_vm2, %v726_v6, %v425_v35  ;;  %v232_v46 = vsel %vm220_vm9, %v648_v34, %v218_v12  ;;  %v418_v50 = vsel %vm415_vm1, %v648_v34, %v412_v23  ;;  %v420_v6 = vsel %vm416_vm10, %v648_v34, %v414_v26 }
  0xd5   :  { %vm1136_vm11 = vcmp.eq.s32.totalorder %v696_v61, 2  ;;  %vm1137_vm0 = vcmp.eq.s32.totalorder %v698_v62, 2  ;;  %vm1138_vm7 = vcmp.eq.s32.totalorder %v700_v63, 2  ;;  %vm1139_vm9 = vcmp.eq.s32.totalorder %v702_v0, 2 }
  0xd6   :  { %v244_v51 = vsel %vm1136_vm11, %v668_v48, %v230_v45  ;;  %v246_v52 = vsel %vm1137_vm0, %v668_v48, %v232_v46  ;;  %v424_v19 = vsel %vm1138_vm7, %v668_v48, %v418_v50  ;;  %v426_v53 = vsel %vm1139_vm9, %v668_v48, %v420_v6 }
  0xd7   :  { %v271_v34 = vsel %vm261_vm8, %v772_v25, %v257_v49  ;;  %vm1140_vm1 = vcmp.eq.s32.totalorder %v698_v62, 4  ;;  %vm1141_vm10 = vcmp.eq.s32.totalorder %v700_v63, 4  ;;  %vm1142_vm13 = vcmp.eq.s32.totalorder %v702_v0, 4 }
  0xd8   :  { %v273_v54 = vsel %vm1140_vm1, %v772_v25, %v259_v31  ;;  %v435_v56 = vsel %vm1141_vm10, %v772_v25, %v429_v43  ;;  %v437_v57 = vsel %vm1142_vm13, %v772_v25, %v431_v44  ;;  %v285_v48 = vsel %vm275_vm3, %v279_v58, %v271_v34  ;;  %vm1143_vm11 = vmmov %vm1140_vm1 }
  0xd9   :  { %v287_v55 = vsel %vm276_vm5, %v279_v58, %v273_v54  ;;  %v441_v59 = vsel %vm439_vm15, %v279_v58, %v435_v56  ;;  %v443_v60 = vsel %vm440_vm6, %v279_v58, %v437_v57  ;;  %289 = vst [vmem:[#allocation2 + $0x10] sm:$0xff] %v285_v48  ;;  %v258_v25 = vsel %vm1132_vm12, %v724_v5, %v244_v51  ;;  %vm1144_vm0 = vmmov %vm1141_vm10 }
  0xda   :  { %291 = vst [vmem:[#allocation2 + $0x30] sm:$0xff] %v287_v55  ;;  %445 = vst [vmem:[#allocation4 + $0x10] sm:$0xff] %v441_v59  ;;  %v260_v1 = vsel %vm1133_vm14, %v724_v5, %v246_v52  ;;  %v430_v2 = vsel %vm1134_vm4, %v724_v5, %v424_v19  ;;  %v432_v3 = vsel %vm1135_vm2, %v724_v5, %v426_v53 }
  0xdb   :  { %447 = vst [vmem:[#allocation4 + $0x30] sm:$0xff] %v443_v60  ;;  %v272_v4 = vsel %vm261_vm8, %v892_v18, %v258_v25  ;;  %v274_v28 = vsel %vm1143_vm11, %v892_v18, %v260_v1  ;;  %v436_v7 = vsel %vm1144_vm0, %v892_v18, %v430_v2  ;;  %vm1145_vm7 = vmmov %vm1142_vm13 }
  0xdc   :  { %v438_v8 = vsel %vm1145_vm7, %v892_v18, %v432_v3  ;;  %v286_v5 = vsel %vm275_vm3, %v283_v9, %v272_v4  ;;  %v288_v10 = vsel %vm276_vm5, %v283_v9, %v274_v28  ;;  %v442_v16 = vsel %vm439_vm15, %v283_v9, %v436_v7 }
  0xdd   :  { %v444_v11 = vsel %vm440_vm6, %v283_v9, %v438_v8  ;;  %290 = vst [vmem:[#allocation2 + $0x18] sm:$0xff] %v286_v5  ;;  %292 = vst [vmem:[#allocation2 + $0x38] sm:$0xff] %v288_v10 }
  0xde   :  { %446 = vst [vmem:[#allocation4 + $0x18] sm:$0xff] %v442_v16  ;;  %448 = vst [vmem:[#allocation4 + $0x38] sm:$0xff] %v444_v11 }
  0xdf   :  { %533 = shalt.err (!%p530_p4)
}
  0xe0   :  { %s534_s9 = scalar_lea.hbm %s1088_s3, 1024 }
  0xe1   :  { %p535_p5 = scmp.ne.s32.totalorder %s1088_s3, %s534_s9  ;;  %p538_p6 = scmp.lt.u32.totalorder %s534_s9, %s1088_s3 }
  0xe3   :  { %p540_p7 = pnand %p538_p6, %p535_p5 }
  0xe5   :  { %543 = shalt.err (!%p540_p7)
}
  0xe6   :  { %s581_s14 = smov 128   ;;  %s582_s15 = smov 8  }
  0xe7   :  { %460 = dma.vmem_to_hbm [thread:$0]  %s455_s29, 1024, %s1088_s3, [#allocation3], %s581_s14, %s581_s14, %s582_s15  }
  0xe8   :  { %s544_s18 = scalar_lea.vmem %s1054_s5, 1024  ;;  %p549_p9 = scmp.lt.s32.totalorder %s1054_s5, %s1054_s5 }
  0xe9   :  { %p545_p8 = scmp.ne.s32.totalorder %s1054_s5, %s544_s18  ;;  %p550_p10 = scmp.lt.s32.totalorder %s544_s18, %s544_s18 }
  0xeb   :  { %p551_p11 = por %p550_p10, %p549_p9 }
  0xed   :  { %p552_p12 = pnand %p551_p11, %p545_p8 }
  0xef   :  { %555 = shalt.err (!%p552_p12)
}
  0xf0   :  { %s556_s21 = scalar_lea.hbm %s1089_s4, 1024 }
  0xf1   :  { %p557_p13 = scmp.ne.s32.totalorder %s1089_s4, %s556_s21  ;;  %p560_p0 = scmp.lt.u32.totalorder %s556_s21, %s1089_s4 }
  0xf3   :  { %p562_p1 = pnand %p560_p0, %p557_p13 }
  0xf5   :  { %565 = shalt.err (!%p562_p1)
}
  0xf6   :  { %472 = dma.vmem_to_hbm [thread:$0]  %s1054_s5, 1024, %s1089_s4, [#allocation5], %s581_s14, %s581_s14, %s582_s15  }
  0xf7   :  { %566 = dma.done.wait [#allocation3], 1024  }
  0xf8   :  { %567 = vsyncadd [#allocation3], 4294966272 }
  0xf9   :  { %568 = dma.done.wait [#allocation5], 1024  }
  0xfa   :  { %569 = vsyncadd [#allocation5], 4294966272 }
  0xfb   :  { %479 = vsyncpa [#allocation3], 1 }
  0xfc   :  { %480 = vsyncpa [#allocation5], 1 }

</bundles_post_ra>
